<compile_context>
chip_gen: v7x
topology: tpu7x:2x2x1
jax: 0.10.0
libtpu: 0.0.40
codegen_flags: <defaults>
</compile_context>

<pallas_src>
import jax
import jax.numpy as jnp
from jax.experimental import pallas as pl
from jax.experimental.pallas import tpu as pltpu


def _expand_kernel(x_ref, w_ref, b_ref, o_ref):
    # x_ref: (TM, K2)   w_ref: (K2, N2)   b_ref: (1, N2)   o_ref: (TM, N2)
    acc = jnp.dot(x_ref[...], w_ref[...], preferred_element_type=jnp.float32)
    o_ref[...] = (acc + b_ref[...]).astype(o_ref.dtype)


def final_patch_expanding(x_nchw, weight, bias, patch_size):
    """x_nchw: (N, Cin, H, W); weight: (Cin, Cout, P, P) (PyTorch ConvTranspose2d
    layout); bias: (Cout,).  Returns (N, Cout, H*P, W*P)."""
    N, Cin, H, W = x_nchw.shape
    Cout = weight.shape[1]
    P = patch_size
    assert weight.shape == (Cin, Cout, P, P)

    M = N * H * W
    n_out = Cout * P * P
    itemsize = jnp.dtype(x_nchw.dtype).itemsize

    # Flatten input pixels into matmul rows: (M, Cin).
    x_rows = jnp.transpose(x_nchw, (0, 2, 3, 1)).reshape(M, Cin)
    # Flatten weight into (Cin, Cout*P*P); bias broadcast over the P*P taps.
    w_mat = weight.reshape(Cin, n_out)
    b_row = jnp.repeat(bias, P * P).reshape(1, n_out)

    # --- Lane-density fold --------------------------------------------------
    # Fold `fold` pixel rows per matmul row (block-diagonal weight) so the
    # output tile is >= 128 lanes wide -> unmasked vst + dense DMA.
    fold = 1
    if n_out < 128:
        fold = pl.cdiv(128, n_out)
        while fold > 1 and M % fold:
            fold -= 1
    K2, N2, M2 = fold * Cin, fold * n_out, M // fold
    if fold > 1:
        x_mm = x_rows.reshape(M2, K2)                              # free reshape
        w_mm = jnp.kron(jnp.eye(fold, dtype=w_mat.dtype), w_mat)   # block-diag
        b_mm = jnp.tile(b_row, (1, fold))
    else:
        x_mm, w_mm, b_mm = x_rows, w_mat, b_row

    # --- Row tile -------------------------------------------------------------
    # Big tiles amortize the ~0.35us per-grid-step overhead; the cap keeps the
    # double-buffered blocks far under the (v7x: 32 MiB scoped) VMEM budget,
    # and we keep >= 2 grid steps so both v7x TensorCores get work.
    if M2 >= 16:
        tm = min(1024, pl.cdiv(M2, 2))
        tm = max(8, (tm // 8) * 8)
    else:
        tm = M2
    grid = (pl.cdiv(M2, tm),)

    cost = pl.CostEstimate(
        flops=2 * M * Cin * n_out,
        transcendentals=0,
        bytes_accessed=(x_mm.size + w_mm.size + b_mm.size + M2 * N2) * itemsize,
    )

    out2 = pl.pallas_call(
        _expand_kernel,
        out_shape=jax.ShapeDtypeStruct((M2, N2), x_mm.dtype),
        grid_spec=pltpu.PrefetchScalarGridSpec(
            num_scalar_prefetch=0,
            grid=grid,
            in_specs=[
                pl.BlockSpec((tm, K2), lambda i: (i, 0)),
                pl.BlockSpec((K2, N2), lambda i: (0, 0)),
                pl.BlockSpec((1, N2), lambda i: (0, 0)),
            ],
            out_specs=pl.BlockSpec((tm, N2), lambda i: (i, 0)),
        ),
        compiler_params=pltpu.CompilerParams(
            dimension_semantics=("parallel",)),
        cost_estimate=cost,
    )(x_mm, w_mm, b_mm)

    # Unfold (free: (M2, fold*Nout) and (M, Nout) share one flat layout).
    out_flat = out2.reshape(M, n_out)
    # TODO(synk): the depth-to-space permutation below still costs one extra HBM
    # read+write of the output; doing it in VMEM inside the kernel needs
    # minor-dim relayout (reshape / rank>2 transpose) support in Mosaic that is
    # not guaranteed to lower, so it is intentionally left to XLA for robustness.
    out = out_flat.reshape(N, H, W, Cout, P, P)
    out = jnp.transpose(out, (0, 3, 1, 4, 2, 5)).reshape(N, Cout, H * P, W * P)
    return out


def _reference(x_nchw, weight, bias, P):
    # Pure-JAX reference of ConvTranspose2d(kernel=stride=P, pad=0)
    N, Cin, H, W = x_nchw.shape
    Cout = weight.shape[1]
    out = jnp.einsum("nchw,coij->nohiwj", x_nchw, weight)
    out = out.reshape(N, Cout, H * P, W * P) + bias[None, :, None, None]
    return out


if __name__ == "__main__":
    key = jax.random.PRNGKey(0)
    k1, k2, k3 = jax.random.split(key, 3)

    # small shapes consistent with the module
    N, dim, H, W = 2, 32, 8, 8
    num_class, P = 4, 4

    x = jax.random.normal(k1, (N, dim, H, W), dtype=jnp.float32)
    # deterministic parameter init (shapes from nn.ConvTranspose2d(dim, num_class, P, P))
    weight = jax.random.normal(k2, (dim, num_class, P, P), dtype=jnp.float32) * 0.05
    bias = jax.random.normal(k3, (num_class,), dtype=jnp.float32) * 0.05

    out = final_patch_expanding(x, weight, bias, P)
    out = jax.block_until_ready(out)

    ref = _reference(x, weight, bias, P)
    assert out.shape == (N, num_class, H * P, W * P)
    assert jnp.allclose(out, ref, atol=1e-4, rtol=1e-4)

    print("KERNEL_OK")
</pallas_src>

<mosaic_0001>
module attributes {stable_mosaic.version = 11 : i64} {
  func.func @_expand_kernel(%arg0: i32, %arg1: memref<32x64xf32, #tpu.memory_space<vmem>>, %arg2: memref<64x128xf32, #tpu.memory_space<vmem>>, %arg3: memref<1x128xf32, #tpu.memory_space<vmem>>, %arg4: memref<32x128xf32, #tpu.memory_space<vmem>>) attributes {dimension_semantics = [#tpu.dimension_semantics<parallel>], iteration_bounds = array<i64: 2>, scalar_prefetch = 0 : i64, scratch_operands = 0 : i64, tpu.core_type = #tpu.core_type<tc>, window_params = [{transform_indices = @transform_0, window_bounds = array<i64: 32, 64>}, {pipeline_mode = #tpu.pipeline_mode<synchronous>, transform_indices = @transform_1, window_bounds = array<i64: 64, 128>}, {pipeline_mode = #tpu.pipeline_mode<synchronous>, transform_indices = @transform_2, window_bounds = array<i64: 1, 128>}, {transform_indices = @transform_3, window_bounds = array<i64: 32, 128>}]} {
    %c0 = arith.constant 0 : index
    %c0_0 = arith.constant 0 : index
    %0 = vector.load %arg1[%c0, %c0_0] : memref<32x64xf32, #tpu.memory_space<vmem>>, vector<32x64xf32>
    %c0_1 = arith.constant 0 : index
    %c0_2 = arith.constant 0 : index
    %1 = vector.load %arg2[%c0_1, %c0_2] : memref<64x128xf32, #tpu.memory_space<vmem>>, vector<64x128xf32>
    %cst = arith.constant dense<0.000000e+00> : vector<32x128xf32>
    %2 = tpu.matmul %0, %1, %cst {dimension_numbers = #tpu.dot_dimension_numbers<[1], [0], [0], [1], [0, 0, 1, 1], [], []>} : vector<32x64xf32>, vector<64x128xf32>, vector<32x128xf32> -> vector<32x128xf32>
    %c0_3 = arith.constant 0 : index
    %c0_4 = arith.constant 0 : index
    %3 = vector.load %arg3[%c0_3, %c0_4] : memref<1x128xf32, #tpu.memory_space<vmem>>, vector<1x128xf32>
    %4 = vector.broadcast %3 : vector<1x128xf32> to vector<32x128xf32>
    %5 = arith.addf %2, %4 : vector<32x128xf32>
    %c0_5 = arith.constant 0 : index
    %c0_6 = arith.constant 0 : index
    %6 = vector.load %arg4[%c0_5, %c0_6] : memref<32x128xf32, #tpu.memory_space<vmem>>, vector<32x128xf32>
    tpu.vector_store %arg4[%c0_5, %c0_6], %5 {strides = array<i32>} : memref<32x128xf32, #tpu.memory_space<vmem>>, vector<32x128xf32>,
    return
  }
  func.func @transform_0(%arg0: i32) -> (i32, i32) {
    %c0_i32 = arith.constant 0 : i32
    %c0_i32_0 = arith.constant 0 : i32
    return %arg0, %c0_i32 : i32, i32
  }
  func.func @transform_1(%arg0: i32) -> (i32, i32) {
    %c0_i32 = arith.constant 0 : i32
    %c0_i32_0 = arith.constant 0 : i32
    %c0_i32_1 = arith.constant 0 : i32
    return %c0_i32, %c0_i32_0 : i32, i32
  }
  func.func @transform_2(%arg0: i32) -> (i32, i32) {
    %c0_i32 = arith.constant 0 : i32
    %c0_i32_0 = arith.constant 0 : i32
    %c0_i32_1 = arith.constant 0 : i32
    return %c0_i32, %c0_i32_0 : i32, i32
  }
  func.func @transform_3(%arg0: i32) -> (i32, i32) {
    %c0_i32 = arith.constant 0 : i32
    %c0_i32_0 = arith.constant 0 : i32
    return %arg0, %c0_i32 : i32, i32
  }
}

</mosaic_0001>

<bundles_post_ra>
// kernel: tpu_custom_call.1
= control target key start
LH: loop header
LB: loop body
LE: loop exit
PB: predicated region body
PF: predicated region fallthrough
CT: control target
= control target key end

     0   :  { %8 = vsyncpa [#allocation3], 0  ;;  %s947_s0 = inlined_call_operand.hbm [shape: f32[64,64], index: 0, kind: input, shape index: {}]   ;;  %s948_s1 = inlined_call_operand.hbm [shape: f32[64,128], index: 1, kind: input, shape index: {}]   ;;  %s949_s2 = inlined_call_operand.vmem [shape: f32[1,128], index: 2, kind: input, shape index: {}]   ;;  %s950_s3 = inlined_call_operand.hbm [shape: f32[64,128], index: 3, kind: output, shape index: {}]  }
   0x1   :  { %10 = vsyncpa [#allocation3 + $0x1], 0 }
   0x2   :  { %11 = vsyncpa [#allocation6], 0 }
   0x3   :  { %12 = vsyncpa [#allocation4], 0 }
   0x4   :  { %14 = vsyncpa [#allocation4 + $0x1], 0  ;;  %s723_s12 = smov 0   ;;  %s725_s13 = smov 0  }
   0x5   :  { %s727_s14 = smov 0   ;;  %s729_s15 = smov 0  }
   0x6 LB: > { %s744_s16 = sadd.s32 4294967295, %s694_s15   ;;  %s424_s17 = sadd.s32 4294967294, %s694_s15   ;;  %s694_s15 = sphi %s729_s15, %s970_s15   ;;  %s690_s14 = sphi %s727_s14, %s969_s14   ;;  %s686_s13 = sphi %s725_s13, %s968_s13   ;;  %s682_s12 = sphi %s723_s12, %s967_s12  }
   0x7   : > { %p40_p0 = scmp.ne.s32.totalorder %s686_s13, %s682_s12  ;;  %p951_p1 = scmp.eq.s32.totalorder %s744_s16, 0 }
   0x8   : > { %p112_p3 = scmp.eq.s32.totalorder %s424_s17, 1  ;;  %p425_p5 = scmp.ge.s32.totalorder %s694_s15, 1 }
   0x9   : > { %p753_p4 = por %p951_p1, %p40_p0  ;;  %p119_p7 = scmp.lt.s32.totalorder %s694_s15, 3 }
   0xa   : > { %p758_p6 = por %p112_p3, %p40_p0  ;;  %s696_s21 = smov [#allocation5]  }
   0xb   : > { %s954_s18 = scalar_select %p753_p4, 1, 0 }
   0xc   : > { %s955_s19 = scalar_select %p758_p6, 1, 0 }
   0xd   : > { %p763_p8 = pnand %p425_p5, %p119_p7  ;;  %s131_s22 = sshll.u32 %s696_s21, 4  ;;  %s767_s22 = int_to_ptr.vmem [resolvable:$true] %s131_s22 }
   0xe   : > { %s779_s24 = sadd.s32 1, %s694_s15   ;;  %s27_s25 = sadd.s32 1, %s690_s14 }
   0xf   : > { %s956_s20 = scalar_select %p763_p8, 1, 0 }
  0x10   : > { %p513_p9 = pneg %p763_p8  ;;  %s24_s26 = ssub.s32 %s694_s15, %s779_s24 }
  0x11   : > { %s566_s29 = scalar_lea.hbm %s948_s1, 1024 }
  0x12   : > { %p774_p11 = pnand %p513_p9, %p951_p1  ;;  %p567_p12 = scmp.ne.s32.totalorder %s948_s1, %s566_s29 }
  0x13   : > { %p573_p5 = scmp.lt.u32.totalorder %s566_s29, %s948_s1 }
  0x14   : > { %p568_p13 = pneg %p774_p11 }
  0x16   : > { %p569_p0 = pnand %p568_p13, %p567_p12 }
  0x18   : > { %p570_p3 = pneg %p569_p0 }
  0x1a   : > { %p575_p7 = pnand %p573_p5, %p570_p3 }
  0x1c   : > { %578 = shalt.err (!%p575_p7)
}
  0x1d   : > { %s579_s7 = scalar_lea.vmem %s767_s22, 1024  ;;  %p587_p2 = scmp.lt.s32.totalorder %s767_s22, %s767_s22 }
  0x1e   : > { %p580_p9 = scmp.ne.s32.totalorder %s767_s22, %s579_s7  ;;  %p588_p6 = scmp.lt.s32.totalorder %s579_s7, %s579_s7 }
  0x20   : > { %p582_p10 = pnand %p580_p9, %p568_p13  ;;  %p589_p4 = por %p588_p6, %p587_p2 }
  0x22   : > { %p583_p1 = pneg %p582_p10 }
  0x24   : > { %p590_p8 = pnand %p589_p4, %p583_p1 }
  0x26   : > { %593 = shalt.err (!%p590_p8)
}
  0x27   : > { %s697_s8 = smov 128   ;;  %s698_s9 = smov 8  }
  0x28   : > { %516 = dma.hbm_to_vmem [thread:$0]  (!%p774_p11), %s948_s1, 1024, %s767_s22, [#allocation6], %s697_s8, %s697_s8, %s698_s9  }
  0x29   : > { %p25_p1 = scmp.eq.s32.totalorder %s24_s26, 0  ;;  %p34_p2 = scmp.ne.s32.totalorder %s690_s14, %s686_s13 }
  0x2a   : > { %p35_p4 = scmp.eq.s32.totalorder %s694_s15, 0  ;;  %p526_p6 = scmp.lt.s32.totalorder %s694_s15, 2 }
  0x2b   : > { %s813_s17 = scalar_select %p25_p1, %s690_s14, %s27_s25  }
  0x2c   : > { %p36_p8 = por %p35_p4, %p34_p2  ;;  %p958_p10 = scmp.eq.s32.totalorder %s744_s16, 1 }
  0x2d   : > { %s148_s23 = sand.u32 1, %s690_s14   ;;  %s445_s27 = sshll.u32 %s694_s15, 9 }
  0x2e   : > { %p817_p12 = por %p958_p10, %p34_p2  ;;  %s428_s28 = sshll.u32 %s148_s23, 5 }
  0x2f   : > { %s826_s4 = scalar_lea.hbm %s947_s0, %s445_s27  ;;  %s152_s22 = scalar_lea.vmem [#allocation2], %s428_s28 }
  0x30   : > { %s159_s25 = sshll.u32 %s152_s22, 4  ;;  %p828_p11 = pnand %p526_p6, %p36_p8  ;;  %s832_s25 = int_to_ptr.vmem [resolvable:$true] %s159_s25 }
  0x31   : > { %s834_s5 = scalar_lea.sflag [#allocation3], %s148_s23  ;;  %s594_s6 = scalar_lea.hbm %s826_s4, 512 }
  0x32   : > { %p595_p13 = scmp.ne.s32.totalorder %s826_s4, %s594_s6  ;;  %p596_p0 = pneg %p828_p11 }
  0x33   : > { %s599_s11 = scalar_lea.hbm %s947_s0, 1024  ;;  %p600_p7 = scmp.lt.u32.totalorder %s826_s4, %s947_s0 }
  0x34   : > { %p597_p3 = pnand %p596_p0, %p595_p13  ;;  %p601_p9 = scmp.lt.u32.totalorder %s599_s11, %s594_s6 }
  0x35   : > { %p603_p2 = scmp.lt.u32.totalorder %s594_s6, %s826_s4 }
  0x36   : > { %p598_p5 = pneg %p597_p3  ;;  %p602_p1 = por %p601_p9, %p600_p7 }
  0x38   : > { %p604_p4 = por %p603_p2, %p602_p1 }
  0x3a   : > { %p605_p6 = pnand %p604_p4, %p598_p5 }
  0x3c   : > { %608 = shalt.err (!%p605_p6)
}
  0x3d   : > { %s609_s23 = scalar_lea.vmem %s832_s25, 512  ;;  %s699_s29 = smov [#allocation2]  }
  0x3e   : > { %p610_p8 = scmp.ne.s32.totalorder %s832_s25, %s609_s23  ;;  %s614_s30 = sshll.u32 %s699_s29, 4  ;;  %s615_s30 = int_to_ptr.vmem [resolvable:$false] %s614_s30 }
  0x3f   : > { %s616_s22 = scalar_lea.vmem %s615_s30, 1024  ;;  %p617_p3 = scmp.lt.s32.totalorder %s832_s25, %s615_s30 }
  0x40   : > { %p612_p10 = pnand %p610_p8, %p596_p0  ;;  %p618_p7 = scmp.lt.s32.totalorder %s616_s22, %s609_s23 }
  0x42   : > { %p613_p13 = pneg %p612_p10  ;;  %p619_p9 = por %p618_p7, %p617_p3 }
  0x44   : > { %p620_p1 = pnand %p619_p9, %p613_p13 }
  0x46   : > { %623 = shalt.err (!%p620_p1)
}
  0x47   : > { %520 = dma.hbm_to_vmem [thread:$0]  (!%p828_p11), %s826_s4, 512, %s832_s25, %s834_s5, %s697_s8, %s697_s8, %s698_s9  }
  0x48   : > { %p961_p0 = scmp.ne.s32.totalorder %s956_s20, 0 }
  0x49   : > { %s868_s6 = sand.u32 (!%p961_p0), 1, %s686_s13   ;;  %p962_p5 = scmp.ne.s32.totalorder (!%p961_p0), %s954_s18, 0 }
  0x4a   : > { %171 = sbr.rel (%p961_p0) target bundleno = 334 (0x14e), region = 32  ;;  %s432_s7 = sshll.u32 (!%p961_p0), %s868_s6, 5 }
  0x4b   : > { %s174_s10 = scalar_lea.sflag (!%p961_p0), [#allocation3], %s868_s6  ;;  %s874_s26 = scalar_lea.vmem (!%p961_p0), [#allocation2], %s432_s7 }
  0x51   : > { %669 = dma.done.wait (%p962_p5), %s174_s10, 512  }
  0x52   : > { %671 = vsyncadd (%p962_p5), %s174_s10, 4294966784  ;;  %p963_p11 = scmp.eq.s32.totalorder %s744_s16, 0 }
  0x54   : > { %673 = dma.done.wait (%p963_p11), [#allocation6], 1024   ;;  %p964_p2 = pmov %p963_p11 }
  0x55   : > { %v210_v0 = vld [vmem:[#allocation5] sm:$0xff]  ;;  %v211_v1 = vld [vmem:[#allocation5 + $0x8] sm:$0xff]  ;;  %v212_v2 = vld [vmem:[#allocation5 + $0x10] sm:$0xff]  ;;  %vm225_vm0 = vcmask 523264   ;;  %s203_s18 = scalar_lea.vmem [#allocation7], %s432_s7  ;;  %s446_s4 = sshll.u32 %s744_s16, 9 }
  0x56   : > { %675 = vsyncadd (%p964_p2), [#allocation6], 4294966272  ;;  %v481_v3 = vpack.c.bf16 %v211_v1, %v210_v0  ;;  %v213_v4 = vld [vmem:[#allocation5 + $0x18] sm:$0xff]  ;;  %v214_v6 = vld [vmem:[#allocation5 + $0x20] sm:$0xff]  ;;  %s341_s20 = sshll.u32 %s203_s18, 4  ;;  %s903_s11 = scalar_lea.hbm %s950_s3, %s446_s4  ;;  %s898_s20 = int_to_ptr.vmem [resolvable:$true] %s341_s20 }
  0x57   : > { %v485_v5 = vpack.c.bf16 %v213_v4, %v212_v2  ;;  %v215_v7 = vld [vmem:[#allocation5 + $0x28] sm:$0xff]  ;;  %v206_v8 = vld [vmem:[%s874_s26] sm:$0xff]  ;;  %v208_v9 = vld [vmem:[%s874_s26 + $0x10] sm:$0xff]  ;;  %s328_s16 = scalar_lea.sflag [#allocation4], %s868_s6  ;;  %s624_s27 = scalar_lea.vmem %s898_s20, 512 }
  0x58   : > { %482 = vmatprep.subr.bf16.mxu0 %v481_v3  ;;  %497 = vmatprep.subr.bf16.mxu1 %v481_v3  ;;  %v489_v10 = vpack.c.bf16 %v215_v7, %v214_v6  ;;  %v216_v11 = vld [vmem:[#allocation5 + $0x30] sm:$0xff]  ;;  %v217_v12 = vld [vmem:[#allocation5 + $0x38] sm:$0xff]  ;;  %v207_v14 = vld [vmem:[%s874_s26 + $0x8] sm:$0xff]  ;;  %p625_p4 = scmp.ne.s32.totalorder %s898_s20, %s624_s27  ;;  %s700_s28 = smov [#allocation7]  }
  0x59   : > { %484 = vmatpush3.bf16.msra.mxu0 %v481_v3  ;;  %501 = vmatpush3.bf16.msra.mxu1 %v481_v3  ;;  %v493_v13 = vpack.c.bf16 %v217_v12, %v216_v11  ;;  %v209_v15 = vld [vmem:[%s874_s26 + $0x18] sm:$0xff]  ;;  %v435_v16 = vld [vmem:[%s949_s2] ss:$0 sm:$0xff]  ;;  %s628_s23 = sshll.u32 %s700_s28, 4  ;;  %s629_s23 = int_to_ptr.vmem [resolvable:$false] %s628_s23 }
  0x5a   : > { %486 = vmatprep.subr.bf16.mxu0 %v485_v5  ;;  %498 = vmatprep.subr.bf16.mxu1 %v485_v5  ;;  %p626_p6 = pnand %p625_p4, %p817_p12  ;;  %s630_s29 = scalar_lea.vmem %s629_s23, 1024 }
  0x5b   : > { %475 = vmatprep.mubr.msk.f32.mxu0 %vm225_vm0, %v206_v8  ;;  %478 = vmatprep.mubr.msk.f32.mxu1 %vm225_vm0, %v208_v9  ;;  %p631_p10 = scmp.lt.s32.totalorder %s898_s20, %s629_s23  ;;  %p632_p13 = scmp.lt.s32.totalorder %s630_s29, %s624_s27 }
  0x5c   : > { %p627_p8 = pneg %p626_p6 }
  0x5d   : > { %488 = vmatpush3.bf16.msra.mxu0 %v485_v5  ;;  %502 = vmatpush3.bf16.msra.mxu1 %v485_v5  ;;  %p633_p3 = por %p632_p13, %p631_p10 }
  0x5e   : > { %490 = vmatprep.subr.bf16.mxu0 %v489_v10  ;;  %499 = vmatprep.subr.bf16.mxu1 %v489_v10 }
  0x5f   : > { %p634_p7 = pnand %p633_p3, %p627_p8 }
  0x61   : > { %492 = vmatpush3.bf16.msra.mxu0 %v489_v10  ;;  %503 = vmatpush3.bf16.msra.mxu1 %v489_v10 }
  0x62   : > { %494 = vmatprep.subr.bf16.mxu0 %v493_v13  ;;  %500 = vmatprep.subr.bf16.mxu1 %v493_v13 }
  0x65   : > { %496 = vmatpush3.bf16.msra.mxu0 %v493_v13  ;;  %504 = vmatpush3.bf16.msra.mxu1 %v493_v13 }
  0x68   : > { %476 = vmatmul.mubr.msk.f32.vlgmr.msra.gmra.mrb[0].mxu0 %vm225_vm0, %v207_v14  ;;  %479 = vmatmul.mubr.msk.f32.vlgmr.msra.gmra.mrb[0].mxu1 %vm225_vm0, %v209_v15 }
 0x13b   : > { %v477_v17 = vpop.f32.mrb[0].mxu0  ;;  %v480_v18 = vpop.f32.mrb[0].mxu1 }
 0x13c   : > { %v310_v19 = vadd.f32 %v477_v17, %v435_v16  ;;  %v320_v20 = vadd.f32 %v480_v18, %v435_v16  ;;  %v304_v21 = vpop.f32.mrb[1].mxu0  ;;  %v314_v22 = vpop.f32.mrb[1].mxu1 }
 0x13d   : > { %v305_v23 = vadd.f32 %v435_v16, %v304_v21  ;;  %v315_v24 = vadd.f32 %v435_v16, %v314_v22 }
 0x13e   : > { %324 = vst [vmem:[%s203_s18 + $0x8] sm:$0xff] %v310_v19  ;;  %326 = vst [vmem:[%s203_s18 + $0x18] sm:$0xff] %v320_v20 }
 0x13f   : > { %323 = vst [vmem:[%s203_s18] sm:$0xff] %v305_v23  ;;  %325 = vst [vmem:[%s203_s18 + $0x10] sm:$0xff] %v315_v24 }
 0x140   : > { %637 = shalt.err (!%p634_p7)
}
 0x141   : > { %s638_s30 = scalar_lea.hbm %s903_s11, 512  ;;  %s642_s10 = scalar_lea.hbm %s950_s3, 1024 }
 0x142   : > { %p639_p9 = scmp.ne.s32.totalorder %s903_s11, %s638_s30  ;;  %p643_p5 = scmp.lt.u32.totalorder %s903_s11, %s950_s3 }
 0x143   : > { %p644_p11 = scmp.lt.u32.totalorder %s642_s10, %s638_s30  ;;  %p646_p4 = scmp.lt.u32.totalorder %s638_s30, %s903_s11 }
 0x144   : > { %p640_p1 = pnand %p639_p9, %p817_p12 }
 0x145   : > { %p645_p2 = por %p644_p11, %p643_p5 }
 0x146   : > { %p641_p0 = pneg %p640_p1 }
 0x147   : > { %p647_p6 = por %p646_p4, %p645_p2 }
 0x149   : > { %p648_p8 = pnand %p647_p6, %p641_p0 }
 0x14b   : > { %651 = shalt.err (!%p648_p8)
}
 0x14c   : > { %s701_s8 = smov 128   ;;  %s702_s9 = smov 8  }
 0x14d   : > { %511 = dma.vmem_to_hbm [thread:$0]  (%p817_p12), %s898_s20, 512, %s903_s11, %s328_s16, %s701_s8, %s701_s8, %s702_s9  }
 0x14e PF: > { %s356_s4 = sand.u32 1, %s682_s12   ;;  %p965_p10 = scmp.ne.s32.totalorder %s955_s19, 0 }
 0x14f   : > { %p966_p13 = scmp.ge.s32.totalorder %s694_s15, 2  ;;  %s357_s25 = scalar_lea.sflag [#allocation4], %s356_s4 }
 0x151   : > { %p522_p3 = pnand %p966_p13, %p965_p10 }
 0x153   : > { %677 = dma.done.wait (!%p522_p3), %s357_s25, 512  }
 0x154   : > { %679 = vsyncadd (!%p522_p3), %s357_s25, 4294966784  ;;  %p17_p7 = scmp.ge.s32.totalorder %s779_s24, 4   ;;  %s967_s12 = smov %s686_s13 }
 0x155   : > { %s968_s13 = smov %s690_s14  ;;  %s969_s14 = smov %s813_s17 }
 0x156   : > { %s970_s15 = smov %s779_s24  ;;  %19 = sbr.rel (!%p17_p7) target bundleno = 6 (0x6), region = 81 }
 0x15d   :  { %362 = vsyncpa [#allocation3], 1 }
 0x15e   :  { %364 = vsyncpa [#allocation3 + $0x1], 1 }
 0x15f   :  { %365 = vsyncpa [#allocation6], 1 }
 0x160   :  { %366 = vsyncpa [#allocation4], 1 }
 0x161   :  { %368 = vsyncpa [#allocation4 + $0x1], 1 }

</bundles_post_ra>
